<compile_context>
chip_gen: v6e
topology: v6e:2x2x1
jax: 0.10.0
libtpu: 0.0.40
codegen_flags: <defaults>
</compile_context>

<pallas_src>
import functools

import jax
import jax.numpy as jnp
from jax.experimental import pallas as pl
from jax.experimental.pallas import tpu as pltpu


def _round_up(x, m):
    return (x + m - 1) // m * m


# ---------------------------------------------------------------------------
# Hardware introspection (all failure-tolerant)
# ---------------------------------------------------------------------------
def _device_kind():
    try:
        return jax.devices()[0].device_kind.lower()
    except Exception:
        return ""


def _vmem_capacity_bytes():
    try:
        return int(pltpu.get_tpu_info().vmem_capacity_bytes)
    except Exception:
        return 64 << 20      # conservative fallback = v7x per-TensorCore VMEM


def _tensorcores_per_chip():
    return 2 if "v7" in _device_kind() else 1


def _mxu_dim():
    kind = _device_kind()
    return 256 if any(t in kind for t in ("v6", "v7", "trillium")) else 128


def _pad_feature(dim):
    if dim <= 128:
        return 128
    return _round_up(dim, _mxu_dim())


def _probe_copy_kernel(x_ref, o_ref):
    o_ref[...] = x_ref[...]


@functools.lru_cache(maxsize=1)
def _single_buffer_supported():
    """Whether pipeline_mode=pl.Buffered(1) is accepted by the installed Pallas."""
    try:
        x = jnp.zeros((8, 128), jnp.float32)
        out = pl.pallas_call(
            _probe_copy_kernel,
            out_shape=jax.ShapeDtypeStruct((8, 128), jnp.float32),
            grid=(1,),
            in_specs=[pl.BlockSpec((8, 128), lambda i: (0, 0),
                                   pipeline_mode=pl.Buffered(1))],
            out_specs=pl.BlockSpec((8, 128), lambda i: (0, 0)),
        )(x)
        jax.block_until_ready(out)
        return True
    except Exception:
        return False


# ---------------------------------------------------------------------------
# Pallas kernel: the whole MLP for one batch tile
# ---------------------------------------------------------------------------
def _mlp_kernel(*refs, n_layers):
    # refs = (x_ref, w0, b0, w1, b1, ..., w{L-1}, b{L-1}, o_ref)
    x_ref = refs[0]
    o_ref = refs[-1]
    wb = refs[1:-1]
    h = x_ref[...].astype(jnp.float32)                    # (bm, K0) f32
    for i in range(n_layers):                             # statically unrolled
        w = wb[2 * i][...]                                 # (K, N_pad) bf16
        b = wb[2 * i + 1][...]                             # (1, N_pad) f32
        # bf16 operands -> native MXU rate; f32 accumulation; f32 epilogue.
        h = jnp.dot(h.astype(jnp.bfloat16), w,
                    preferred_element_type=jnp.float32) + b
        if i != n_layers - 1:                              # ReLU on hidden layers only
            h = jnp.maximum(h, 0.0)
    o_ref[...] = h.astype(o_ref.dtype)


# ---------------------------------------------------------------------------
# Parameter init (PyTorch nn.Linear default init) + one-time inference prep
# ---------------------------------------------------------------------------
def init_linear_dqn(key, n_inp, features, n_actions):
    """Torch-layout params: list of dicts with w:(fan_out, fan_in), b:(fan_out,)."""
    sizes = [n_inp] + list(features) + [n_actions]
    layers = []
    for i in range(len(sizes) - 1):
        key, k1, k2 = jax.random.split(key, 3)
        fan_in, fan_out = sizes[i], sizes[i + 1]
        bound = 1.0 / jnp.sqrt(float(fan_in))
        layers.append(dict(
            w=jax.random.uniform(k1, (fan_out, fan_in), jnp.float32, -bound, bound),
            b=jax.random.uniform(k2, (fan_out,), jnp.float32, -bound, bound),
        ))
    return layers


def prepare_inference_params(torch_layers):
    """One-time layout plumbing:
      * transpose weights to (fan_in, fan_out),
      * zero-pad internal feature dims to MXU-friendly multiples (lane-dense),
      * weights -> bf16 (MXU operands), biases stay f32 (f32 epilogue),
      * the very first K dim (= n_inp) stays UNPADDED so the wrapper never
        materializes a column-padded copy of the batch in HBM.
    Zero-padded rows/cols contribute exactly 0 -> numerics unchanged (modulo bf16)."""
    prep_layers = []
    in_dim = torch_layers[0]["w"].shape[1]
    k_dim = in_dim
    for layer in torch_layers:
        fan_out, fan_in = layer["w"].shape
        n_pad = _pad_feature(fan_out)
        w = jnp.zeros((k_dim, n_pad), jnp.float32)
        w = w.at[:fan_in, :fan_out].set(layer["w"].T).astype(jnp.bfloat16)
        b = jnp.zeros((1, n_pad), jnp.float32).at[0, :fan_out].set(layer["b"])
        prep_layers.append((w, b))
        k_dim = n_pad
    return dict(layers=prep_layers,
                in_dim=in_dim,
                out_dim=torch_layers[-1]["w"].shape[0],
                out_pad=prep_layers[-1][0].shape[1])


# ---------------------------------------------------------------------------
# Forward wrapper
# ---------------------------------------------------------------------------
def linear_dqn_forward(prep, state, *, block_m=1024, vmem_budget_bytes=None):
    """Equivalent of Linear_DQN.forward(state): (B, n_inp) -> (B, n_actions)."""
    B, n_inp = state.shape
    assert n_inp == prep["in_dim"]
    out_pad = prep["out_pad"]
    layers = prep["layers"]

    # --- VMEM budget: generation-aware (~48 MiB on v7x, ~96 MiB on v5e/v6e) ----
    cap = _vmem_capacity_bytes()
    if vmem_budget_bytes is None:
        vmem_budget_bytes = int(cap * 0.75)
    vmem_budget_bytes = min(vmem_budget_bytes, int(cap * 0.85))

    single_buf = _single_buffer_supported()
    wbuf = 1 if single_buf else 2

    # --- VMEM accounting (bytes) ------------------------------------------
    layer_bytes = sum(w.size * w.dtype.itemsize + b.size * b.dtype.itemsize
                      for w, b in layers)
    io_row = 4 * (n_inp + out_pad)                     # one x row + one out row (f32)
    inter_row = 0                                      # per-row hidden intermediates
    for w, _ in layers:
        k, n = w.shape
        inter_row += 2 * k + 4 * n                     # bf16 dot input + f32 accumulator
    row_bytes = 2 * io_row + inter_row                 # x / out streams double-buffered

    avail = vmem_budget_bytes - wbuf * layer_bytes
    bm_cap = max(16, (avail // row_bytes) // 16 * 16) if avail > 0 else 16
    bm_cap = min(bm_cap, max(16, block_m))

    # --- batch tiling: pad waste bounded by < 16*grid rows ------------------
    Mp0 = _round_up(max(B, 16), 16)
    grid = pl.cdiv(Mp0, bm_cap)
    tc = _tensorcores_per_chip()
    if tc > 1:
        max_tiles = Mp0 // 16
        grid = min(max(grid, tc), max_tiles)           # keep both TensorCores busy
        if grid % tc and (grid + (tc - grid % tc)) <= max_tiles:
            grid += tc - grid % tc                     # prefer an even core split
    bm = _round_up(pl.cdiv(Mp0, grid), 16)
    Mp = grid * bm

    x = state.astype(jnp.float32)
    if Mp != B:
        x = jnp.pad(x, ((0, Mp - B), (0, 0)))          # row padding only, no column pad

    # --- specs ---------------------------------------------------------------
    w_kwargs = dict(pipeline_mode=pl.Buffered(1)) if single_buf else {}
    wb_args = []
    in_specs = [pl.BlockSpec((bm, n_inp), lambda i: (i, 0))]
    for w, b in layers:
        wb_args += [w, b]
        in_specs += [pl.BlockSpec(w.shape, lambda i: (0, 0), **w_kwargs),
                     pl.BlockSpec(b.shape, lambda i: (0, 0), **w_kwargs)]

    # vmem limit from the actual footprint (2x weights as worst-case headroom).
    footprint = 2 * layer_bytes + bm * row_bytes
    vmem_limit = int(min(cap * 0.9, max(32 << 20, footprint + (8 << 20))))

    out = pl.pallas_call(
        functools.partial(_mlp_kernel, n_layers=len(layers)),
        out_shape=jax.ShapeDtypeStruct((Mp, out_pad), jnp.float32),
        grid=(grid,),
        in_specs=in_specs,
        out_specs=pl.BlockSpec((bm, out_pad), lambda i: (i, 0)),
        compiler_params=pltpu.CompilerParams(
            dimension_semantics=("parallel",),
            vmem_limit_bytes=vmem_limit),
    )(x, *wb_args)
    return out[:B, :prep["out_dim"]]


# ---------------------------------------------------------------------------
if __name__ == "__main__":
    batch = 2
    n_inp = 8
    features = [32, 32]
    n_actions = 4

    root = jax.random.PRNGKey(0)
    k_params, k_state = jax.random.split(root)

    torch_params = init_linear_dqn(k_params, n_inp, features, n_actions)
    prep = prepare_inference_params(torch_params)
    state = jax.random.normal(k_state, (batch, n_inp), jnp.float32)

    q = linear_dqn_forward(prep, state)
    q = jax.block_until_ready(q)

    # Pure-JAX f32 reference of the PyTorch forward for a sanity check.
    ref = state
    for i, layer in enumerate(torch_params):
        ref = ref @ layer["w"].T + layer["b"]
        if i != len(torch_params) - 1:
            ref = jnp.maximum(ref, 0.0)

    assert q.shape == (batch, n_actions)
    assert bool(jnp.all(jnp.isfinite(q)))
    assert bool(jnp.allclose(q, ref, atol=5e-2, rtol=5e-2)), (q, ref)
    print("KERNEL_OK")
</pallas_src>

<mosaic_0001>
module attributes {stable_mosaic.version = 11 : i64} {
  func.func @_probe_copy_kernel(%arg0: i32, %arg1: memref<8x128xf32, #tpu.memory_space<vmem>>, %arg2: memref<8x128xf32, #tpu.memory_space<vmem>>) attributes {dimension_semantics = [#tpu.dimension_semantics<arbitrary>], iteration_bounds = array<i64: 1>, scalar_prefetch = 0 : i64, scratch_operands = 0 : i64, tpu.core_type = #tpu.core_type<tc>, window_params = [{pipeline_mode = #tpu.pipeline_mode<synchronous>, transform_indices = @transform_0, window_bounds = array<i64: 8, 128>}, {pipeline_mode = #tpu.pipeline_mode<synchronous>, transform_indices = @transform_1, window_bounds = array<i64: 8, 128>}]} {
    %c0 = arith.constant 0 : index
    %c0_0 = arith.constant 0 : index
    %0 = vector.load %arg1[%c0, %c0_0] : memref<8x128xf32, #tpu.memory_space<vmem>>, vector<8x128xf32>
    %c0_1 = arith.constant 0 : index
    %c0_2 = arith.constant 0 : index
    %1 = vector.load %arg2[%c0_1, %c0_2] : memref<8x128xf32, #tpu.memory_space<vmem>>, vector<8x128xf32>
    tpu.vector_store %arg2[%c0_1, %c0_2], %0 {strides = array<i32>} : memref<8x128xf32, #tpu.memory_space<vmem>>, vector<8x128xf32>,
    return
  }
  func.func @transform_0(%arg0: i32) -> (i32, i32) {
    %c0_i32 = arith.constant 0 : i32
    %c0_i32_0 = arith.constant 0 : i32
    %c0_i32_1 = arith.constant 0 : i32
    return %c0_i32, %c0_i32_0 : i32, i32
  }
  func.func @transform_1(%arg0: i32) -> (i32, i32) {
    %c0_i32 = arith.constant 0 : i32
    %c0_i32_0 = arith.constant 0 : i32
    %c0_i32_1 = arith.constant 0 : i32
    return %c0_i32, %c0_i32_0 : i32, i32
  }
}

module attributes {stable_mosaic.version = 11 : i64} {
  func.func @_mlp_kernel(%arg0: i32, %arg1: memref<16x8xf32, #tpu.memory_space<vmem>>, %arg2: memref<8x128xbf16, #tpu.memory_space<vmem>>, %arg3: memref<1x128xf32, #tpu.memory_space<vmem>>, %arg4: memref<128x128xbf16, #tpu.memory_space<vmem>>, %arg5: memref<1x128xf32, #tpu.memory_space<vmem>>, %arg6: memref<128x128xbf16, #tpu.memory_space<vmem>>, %arg7: memref<1x128xf32, #tpu.memory_space<vmem>>, %arg8: memref<16x128xf32, #tpu.memory_space<vmem>>) attributes {dimension_semantics = [#tpu.dimension_semantics<parallel>], iteration_bounds = array<i64: 1>, scalar_prefetch = 0 : i64, scratch_operands = 0 : i64, tpu.core_type = #tpu.core_type<tc>, window_params = [{transform_indices = @transform_0, window_bounds = array<i64: 16, 8>}, {pipeline_mode = #tpu.pipeline_mode<synchronous>, transform_indices = @transform_1, window_bounds = array<i64: 8, 128>}, {pipeline_mode = #tpu.pipeline_mode<synchronous>, transform_indices = @transform_2, window_bounds = array<i64: 1, 128>}, {pipeline_mode = #tpu.pipeline_mode<synchronous>, transform_indices = @transform_3, window_bounds = array<i64: 128, 128>}, {pipeline_mode = #tpu.pipeline_mode<synchronous>, transform_indices = @transform_4, window_bounds = array<i64: 1, 128>}, {pipeline_mode = #tpu.pipeline_mode<synchronous>, transform_indices = @transform_5, window_bounds = array<i64: 128, 128>}, {pipeline_mode = #tpu.pipeline_mode<synchronous>, transform_indices = @transform_6, window_bounds = array<i64: 1, 128>}, {transform_indices = @transform_7, window_bounds = array<i64: 16, 128>}]} {
    %c0 = arith.constant 0 : index
    %c0_0 = arith.constant 0 : index
    %0 = vector.load %arg1[%c0, %c0_0] : memref<16x8xf32, #tpu.memory_space<vmem>>, vector<16x8xf32>
    %c0_1 = arith.constant 0 : index
    %c0_2 = arith.constant 0 : index
    %1 = vector.load %arg2[%c0_1, %c0_2] : memref<8x128xbf16, #tpu.memory_space<vmem>>, vector<8x128xbf16>
    %c0_3 = arith.constant 0 : index
    %c0_4 = arith.constant 0 : index
    %2 = vector.load %arg3[%c0_3, %c0_4] : memref<1x128xf32, #tpu.memory_space<vmem>>, vector<1x128xf32>
    %3 = arith.truncf %0 : vector<16x8xf32> to vector<16x8xbf16>
    %cst = arith.constant dense<0.000000e+00> : vector<16x128xf32>
    %4 = tpu.matmul %3, %1, %cst {dimension_numbers = #tpu.dot_dimension_numbers<[1], [0], [0], [1], [0, 0, 1, 1], [], []>} : vector<16x8xbf16>, vector<8x128xbf16>, vector<16x128xf32> -> vector<16x128xf32>
    %5 = vector.broadcast %2 : vector<1x128xf32> to vector<16x128xf32>
    %6 = arith.addf %4, %5 : vector<16x128xf32>
    %cst_5 = arith.constant 0.000000e+00 : f32
    %7 = vector.broadcast %cst_5 : f32 to vector<16x128xf32>
    %8 = arith.maximumf %6, %7 : vector<16x128xf32>
    %c0_6 = arith.constant 0 : index
    %c0_7 = arith.constant 0 : index
    %9 = vector.load %arg4[%c0_6, %c0_7] : memref<128x128xbf16, #tpu.memory_space<vmem>>, vector<128x128xbf16>
    %c0_8 = arith.constant 0 : index
    %c0_9 = arith.constant 0 : index
    %10 = vector.load %arg5[%c0_8, %c0_9] : memref<1x128xf32, #tpu.memory_space<vmem>>, vector<1x128xf32>
    %11 = arith.truncf %8 : vector<16x128xf32> to vector<16x128xbf16>
    %cst_10 = arith.constant dense<0.000000e+00> : vector<16x128xf32>
    %12 = tpu.matmul %11, %9, %cst_10 {dimension_numbers = #tpu.dot_dimension_numbers<[1], [0], [0], [1], [0, 0, 1, 1], [], []>} : vector<16x128xbf16>, vector<128x128xbf16>, vector<16x128xf32> -> vector<16x128xf32>
    %13 = vector.broadcast %10 : vector<1x128xf32> to vector<16x128xf32>
    %14 = arith.addf %12, %13 : vector<16x128xf32>
    %cst_11 = arith.constant 0.000000e+00 : f32
    %15 = vector.broadcast %cst_11 : f32 to vector<16x128xf32>
    %16 = arith.maximumf %14, %15 : vector<16x128xf32>
    %c0_12 = arith.constant 0 : index
    %c0_13 = arith.constant 0 : index
    %17 = vector.load %arg6[%c0_12, %c0_13] : memref<128x128xbf16, #tpu.memory_space<vmem>>, vector<128x128xbf16>
    %c0_14 = arith.constant 0 : index
    %c0_15 = arith.constant 0 : index
    %18 = vector.load %arg7[%c0_14, %c0_15] : memref<1x128xf32, #tpu.memory_space<vmem>>, vector<1x128xf32>
    %19 = arith.truncf %16 : vector<16x128xf32> to vector<16x128xbf16>
    %cst_16 = arith.constant dense<0.000000e+00> : vector<16x128xf32>
    %20 = tpu.matmul %19, %17, %cst_16 {dimension_numbers = #tpu.dot_dimension_numbers<[1], [0], [0], [1], [0, 0, 1, 1], [], []>} : vector<16x128xbf16>, vector<128x128xbf16>, vector<16x128xf32> -> vector<16x128xf32>
    %21 = vector.broadcast %18 : vector<1x128xf32> to vector<16x128xf32>
    %22 = arith.addf %20, %21 : vector<16x128xf32>
    %c0_17 = arith.constant 0 : index
    %c0_18 = arith.constant 0 : index
    %23 = vector.load %arg8[%c0_17, %c0_18] : memref<16x128xf32, #tpu.memory_space<vmem>>, vector<16x128xf32>
    tpu.vector_store %arg8[%c0_17, %c0_18], %22 {strides = array<i32>} : memref<16x128xf32, #tpu.memory_space<vmem>>, vector<16x128xf32>,
    return
  }
  func.func @transform_0(%arg0: i32) -> (i32, i32) {
    %c0_i32 = arith.constant 0 : i32
    %c0_i32_0 = arith.constant 0 : i32
    return %arg0, %c0_i32 : i32, i32
  }
  func.func @transform_1(%arg0: i32) -> (i32, i32) {
    %c0_i32 = arith.constant 0 : i32
    %c0_i32_0 = arith.constant 0 : i32
    %c0_i32_1 = arith.constant 0 : i32
    return %c0_i32, %c0_i32_0 : i32, i32
  }
  func.func @transform_2(%arg0: i32) -> (i32, i32) {
    %c0_i32 = arith.constant 0 : i32
    %c0_i32_0 = arith.constant 0 : i32
    %c0_i32_1 = arith.constant 0 : i32
    return %c0_i32, %c0_i32_0 : i32, i32
  }
  func.func @transform_3(%arg0: i32) -> (i32, i32) {
    %c0_i32 = arith.constant 0 : i32
    %c0_i32_0 = arith.constant 0 : i32
    %c0_i32_1 = arith.constant 0 : i32
    return %c0_i32, %c0_i32_0 : i32, i32
  }
  func.func @transform_4(%arg0: i32) -> (i32, i32) {
    %c0_i32 = arith.constant 0 : i32
    %c0_i32_0 = arith.constant 0 : i32
    %c0_i32_1 = arith.constant 0 : i32
    return %c0_i32, %c0_i32_0 : i32, i32
  }
  func.func @transform_5(%arg0: i32) -> (i32, i32) {
    %c0_i32 = arith.constant 0 : i32
    %c0_i32_0 = arith.constant 0 : i32
    %c0_i32_1 = arith.constant 0 : i32
    return %c0_i32, %c0_i32_0 : i32, i32
  }
  func.func @transform_6(%arg0: i32) -> (i32, i32) {
    %c0_i32 = arith.constant 0 : i32
    %c0_i32_0 = arith.constant 0 : i32
    %c0_i32_1 = arith.constant 0 : i32
    return %c0_i32, %c0_i32_0 : i32, i32
  }
  func.func @transform_7(%arg0: i32) -> (i32, i32) {
    %c0_i32 = arith.constant 0 : i32
    %c0_i32_0 = arith.constant 0 : i32
    return %arg0, %c0_i32 : i32, i32
  }
}

</mosaic_0001>

<bundles_post_ra>
// kernel: tpu_custom_call.1
= control target key start
LH: loop header
LB: loop body
LE: loop exit
PB: predicated region body
PF: predicated region fallthrough
CT: control target
= control target key end

     0   :  { %6 = vsyncpa [#allocation3], 0  ;;  %s102_s0 = inlined_call_operand.hbm [shape: f32[8,128], index: 0, kind: input, shape index: {}]   ;;  %s103_s1 = inlined_call_operand.hbm [shape: f32[8,128], index: 1, kind: output, shape index: {}]  }
   0x1   :  { %7 = vsyncpa [#allocation4], 0  ;;  %s84_s6 = smov [#allocation2]  }
   0x2   :  { %s14_s7 = sshll.u32 %s84_s6, 4  ;;  %s15_s7 = int_to_ptr.vmem [resolvable:$true] %s14_s7 }
   0x3   :  { %s48_s8 = scalar_lea.vmem %s15_s7, 128  ;;  %p53_p1 = scmp.lt.s32.totalorder %s15_s7, %s15_s7 }
   0x4   :  { %p49_p0 = scmp.ne.s32.totalorder %s15_s7, %s48_s8  ;;  %p54_p2 = scmp.lt.s32.totalorder %s48_s8, %s48_s8 }
   0x6   :  { %p55_p3 = por %p54_p2, %p53_p1 }
   0x8   :  { %p56_p4 = pnand %p55_p3, %p49_p0 }
   0xa   :  { %59 = shalt.err (!%p56_p4)
}
   0xb   :  { %17 = dma.hbm_to_vmem [thread:$0]  %s102_s0, 128, %s15_s7, [#allocation3]  }
   0xc   :  { %80 = dma.done.wait [#allocation3], 128  }
   0xd   :  { %81 = vsyncadd [#allocation3], 4294967168  ;;  %s85_s11 = smov [#allocation5]   ;;  %v21_v0 = vld [vmem:[#allocation2] sm:$0xff] }
   0xe   :  { %s29_s12 = sshll.u32 %s85_s11, 4  ;;  %22 = vst [vmem:[#allocation5] sm:$0xff] %v21_v0  ;;  %s30_s12 = int_to_ptr.vmem [resolvable:$true] %s29_s12 }
   0xf   :  { %s60_s13 = scalar_lea.vmem %s30_s12, 128  ;;  %p65_p6 = scmp.lt.s32.totalorder %s30_s12, %s30_s12 }
  0x10   :  { %p61_p5 = scmp.ne.s32.totalorder %s30_s12, %s60_s13  ;;  %p66_p7 = scmp.lt.s32.totalorder %s60_s13, %s60_s13 }
  0x12   :  { %p67_p8 = por %p66_p7, %p65_p6 }
  0x14   :  { %p68_p9 = pnand %p67_p8, %p61_p5 }
  0x16   :  { %71 = shalt.err (!%p68_p9)
}
  0x17   :  { %32 = dma.vmem_to_hbm [thread:$0]  %s30_s12, 128, %s103_s1, [#allocation4]  }
  0x18   :  { %82 = dma.done.wait [#allocation4], 128  }
  0x19   :  { %83 = vsyncadd [#allocation4], 4294967168 }
  0x1a   :  { %36 = vsyncpa [#allocation3], 1 }
  0x1b   :  { %37 = vsyncpa [#allocation4], 1 }

// kernel: tpu_custom_call.1
= control target key start
LH: loop header
LB: loop body
LE: loop exit
PB: predicated region body
PF: predicated region fallthrough
CT: control target
= control target key end

     0   :  { %12 = vsyncpa [#allocation3], 0  ;;  %s642_s0 = inlined_call_operand.vmem [shape: f32[16,8], index: 0, kind: input, shape index: {}]   ;;  %s643_s1 = inlined_call_operand.vmem [shape: bf16[8,128], index: 1, kind: input, shape index: {}]   ;;  %s644_s2 = inlined_call_operand.vmem [shape: f32[1,128], index: 2, kind: input, shape index: {}]   ;;  %s645_s3 = inlined_call_operand.hbm [shape: bf16[128,128], index: 3, kind: input, shape index: {}]   ;;  %s646_s4 = inlined_call_operand.vmem [shape: f32[1,128], index: 4, kind: input, shape index: {}]   ;;  %s647_s5 = inlined_call_operand.hbm [shape: bf16[128,128], index: 5, kind: input, shape index: {}]   ;;  %s648_s6 = inlined_call_operand.vmem [shape: f32[1,128], index: 6, kind: input, shape index: {}]   ;;  %s649_s7 = inlined_call_operand.hbm [shape: f32[16,128], index: 7, kind: output, shape index: {}]  }
   0x1   :  { %13 = vsyncpa [#allocation6], 0 }
   0x2   :  { %14 = vsyncpa [#allocation4], 0  ;;  %s543_s24 = smov [#allocation2]  }
   0x3   :  { %s26_s25 = sshll.u32 %s543_s24, 4  ;;  %s27_s25 = int_to_ptr.vmem [resolvable:$true] %s26_s25 }
   0x4   :  { %s485_s26 = scalar_lea.vmem %s27_s25, 1024  ;;  %p490_p1 = scmp.lt.s32.totalorder %s27_s25, %s27_s25 }
   0x5   :  { %p486_p0 = scmp.ne.s32.totalorder %s27_s25, %s485_s26  ;;  %p491_p2 = scmp.lt.s32.totalorder %s485_s26, %s485_s26 }
   0x7   :  { %p492_p3 = por %p491_p2, %p490_p1 }
   0x9   :  { %p493_p4 = pnand %p492_p3, %p486_p0 }
   0xb   :  { %496 = shalt.err (!%p493_p4)
}
   0xc   :  { %s544_s27 = smov 64   ;;  %s545_s28 = smov 4  }
   0xd   :  { %32 = dma.hbm_to_vmem [thread:$0]  %s645_s3, 1024, %s27_s25, [#allocation3], %s544_s27, %s544_s27, %s545_s28  }
   0xe   :  { %s546_s8 = smov [#allocation5]  }
   0xf   :  { %s40_s9 = sshll.u32 %s546_s8, 4  ;;  %s41_s9 = int_to_ptr.vmem [resolvable:$true] %s40_s9 }
  0x10   :  { %s505_s10 = scalar_lea.vmem %s41_s9, 1024  ;;  %p510_p6 = scmp.lt.s32.totalorder %s41_s9, %s41_s9 }
  0x11   :  { %p506_p5 = scmp.ne.s32.totalorder %s41_s9, %s505_s10  ;;  %p511_p7 = scmp.lt.s32.totalorder %s505_s10, %s505_s10 }
  0x13   :  { %p512_p8 = por %p511_p7, %p510_p6 }
  0x15   :  { %p513_p9 = pnand %p512_p8, %p506_p5 }
  0x17   :  { %516 = shalt.err (!%p513_p9)
}
  0x18   :  { %46 = dma.hbm_to_vmem [thread:$0]  %s647_s5, 1024, %s41_s9, [#allocation6], %s544_s27, %s544_s27, %s545_s28  }
  0x19   :  { %537 = dma.done.wait [#allocation3], 1024  }
  0x1a   :  { %538 = vsyncadd [#allocation3], 4294966272 }
  0x1b   :  { %539 = dma.done.wait [#allocation6], 1024  }
  0x1c   :  { %540 = vsyncadd [#allocation6], 4294966272  ;;  %v547_v0 = vmov 0.0   ;;  %vm548_vm0 = vmmov 0   ;;  %vm71_vm1 = vcmask 1043456   ;;  %v56_v2 = vld [vmem:[%s642_s0] sm:$0xff] }
  0x1d   :  { %406 = vmatprep.subr.bf16.mxu0 %v547_v0  ;;  %408 = vmatprep.mubr.msk.bf16.mxu0 %vm548_vm0, %v547_v0  ;;  %v58_v1 = vld [vmem:[%s643_s1] sm:$0xf]  ;;  %v57_v3 = vld [vmem:[%s642_s0 + $0x8] sm:$0xff]  ;;  %v461_v6 = vld [vmem:[#allocation2 + $0x38] sm:$0xff]   ;;  %vm67_vm2 = vcmask 64512   ;;  %s549_s20 = smov [#allocation7]  }
  0x1e   :  { %412 = vmatprep.subr.bf16.mxu1 %v547_v0  ;;  %428 = vmatprep.mubr.msk.bf16.mxu1 %vm548_vm0, %v547_v0  ;;  %v73_v4 = vsel %vm71_vm1, %v58_v1, 0  ;;  %v60_v5 = vpack.c.bf16 %v57_v3, %v56_v2  ;;  %v462_v7 = vld [vmem:[#allocation2 + $0x30] sm:$0xff]   ;;  %v463_v8 = vld [vmem:[#allocation2 + $0x28] sm:$0xff]   ;;  %v464_v9 = vld [vmem:[#allocation2 + $0x20] sm:$0xff]   ;;  %s353_s21 = sshll.u32 %s549_s20, 4  ;;  %s354_s21 = int_to_ptr.vmem [resolvable:$true] %s353_s21 }
  0x1f   :  { %407 = vmatpush3.bf16.msra.mxu0 %v73_v4  ;;  %413 = vmatpush3.bf16.msra.mxu1 %v461_v6  ;;  %v465_v10 = vld [vmem:[#allocation2 + $0x18] sm:$0xff]   ;;  %v466_v11 = vld [vmem:[#allocation2 + $0x10] sm:$0xff]   ;;  %v467_v12 = vld [vmem:[#allocation2 + $0x8] sm:$0xff]   ;;  %p522_p11 = scmp.lt.s32.totalorder %s354_s21, %s354_s21 }
  0x20   :  { %432 = vmatprep.subr.bf16.mxu0 %v547_v0  ;;  %414 = vmatprep.subr.bf16.mxu1 %v547_v0  ;;  %v468_v13 = vld [vmem:[#allocation2] sm:$0xff]   ;;  %v469_v14 = vld [vmem:[#allocation5 + $0x38] sm:$0xff]   ;;  %v470_v15 = vld [vmem:[#allocation5 + $0x30] sm:$0xff]  }
  0x21   :  { %v471_v16 = vld [vmem:[#allocation5 + $0x28] sm:$0xff]   ;;  %v472_v17 = vld [vmem:[#allocation5 + $0x20] sm:$0xff]   ;;  %v473_v18 = vld [vmem:[#allocation5 + $0x18] sm:$0xff]  }
  0x22   :  { %409 = vmatmul.mubr.msk.bf16.vlgmr.msra.gmra.mxu0 %vm67_vm2, %v60_v5  ;;  %v366_v19 = vld [vmem:[%s644_s2] ss:$0 sm:$0xff]  ;;  %v474_v29 = vld [vmem:[#allocation5 + $0x10] sm:$0xff]   ;;  %v475_v30 = vld [vmem:[#allocation5 + $0x8] sm:$0xff]  }
  0x23   :  { %448 = vmatprep.mubr.msk.bf16.mxu0 %vm548_vm0, %v547_v0  ;;  %415 = vmatpush3.bf16.msra.mxu1 %v462_v7  ;;  %v476_v31 = vld [vmem:[#allocation5] sm:$0xff]  }
  0x24   :  { %416 = vmatprep.subr.bf16.mxu1 %v547_v0  ;;  %433 = vmatpush3.bf16.msra.mxu0 %v469_v14  ;;  %v368_v32 = vld [vmem:[%s646_s4] ss:$0 sm:$0xff]  ;;  %s517_s4 = scalar_lea.vmem %s354_s21, 256 }
  0x25   :  { %434 = vmatprep.subr.bf16.mxu0 %v547_v0  ;;  %v377_v42 = vld [vmem:[%s648_s6] ss:$0 sm:$0xff]  ;;  %p518_p10 = scmp.ne.s32.totalorder %s354_s21, %s517_s4  ;;  %p523_p12 = scmp.lt.s32.totalorder %s517_s4, %s517_s4 }
  0x27   :  { %417 = vmatpush3.bf16.msra.mxu1 %v463_v8  ;;  %p524_p13 = por %p523_p12, %p522_p11 }
  0x28   :  { %418 = vmatprep.subr.bf16.mxu1 %v547_v0  ;;  %435 = vmatpush3.bf16.msra.mxu0 %v470_v15 }
  0x29   :  { %436 = vmatprep.subr.bf16.mxu0 %v547_v0  ;;  %p525_p0 = pnand %p524_p13, %p518_p10 }
  0x2b   :  { %419 = vmatpush3.bf16.msra.mxu1 %v464_v9 }
  0x2c   :  { %420 = vmatprep.subr.bf16.mxu1 %v547_v0  ;;  %437 = vmatpush3.bf16.msra.mxu0 %v471_v16 }
  0x2d   :  { %438 = vmatprep.subr.bf16.mxu0 %v547_v0 }
  0x2f   :  { %421 = vmatpush3.bf16.msra.mxu1 %v465_v10 }
  0x30   :  { %422 = vmatprep.subr.bf16.mxu1 %v547_v0  ;;  %439 = vmatpush3.bf16.msra.mxu0 %v472_v17 }
  0x31   :  { %440 = vmatprep.subr.bf16.mxu0 %v547_v0 }
  0x33   :  { %423 = vmatpush3.bf16.msra.mxu1 %v466_v11 }
  0x34   :  { %424 = vmatprep.subr.bf16.mxu1 %v547_v0  ;;  %441 = vmatpush3.bf16.msra.mxu0 %v473_v18 }
  0x35   :  { %442 = vmatprep.subr.bf16.mxu0 %v547_v0 }
  0x37   :  { %425 = vmatpush3.bf16.msra.mxu1 %v467_v12 }
  0x38   :  { %426 = vmatprep.subr.bf16.mxu1 %v547_v0  ;;  %443 = vmatpush3.bf16.msra.mxu0 %v474_v29 }
  0x39   :  { %444 = vmatprep.subr.bf16.mxu0 %v547_v0 }
  0x3b   :  { %427 = vmatpush3.bf16.msra.mxu1 %v468_v13 }
  0x3c   :  { %445 = vmatpush3.bf16.msra.mxu0 %v475_v30 }
  0x3d   :  { %446 = vmatprep.subr.bf16.mxu0 %v547_v0 }
  0x40   :  { %447 = vmatpush3.bf16.msra.mxu0 %v476_v31 }
  0xe2   :  { %v109_v20 = vpop.f32.mrf.mxu0 }
  0xe3   :  { %v110_v22 = vadd.f32 %v366_v19, %v109_v20 }
  0xe4   :  { %v410_v21 = vpop.f32.mrf.mxu0 }
  0xe5   :  { %v116_v26 = vmax.f32 %v110_v22, 0.0 }
  0xe6   :  { %v112_v23 = vpop.f32.mrf.mxu0 }
  0xe7   :  { %v113_v24 = vadd.f32 %v366_v19, %v112_v23 }
  0xe8   :  { %v411_v25 = vpop.f32.mrf.mxu0 }
  0xe9   :  { %v117_v27 = vmax.f32 %v113_v24, 0.0 }
  0xeb   :  { %v135_v28 = vpack.c.bf16 %v117_v27, %v116_v26 }
  0xed   :  { %429 = vmatmul.mubr.bf16.vlgmr.msra.gmra.mxu1 %v135_v28 }
 0x1ad   :  { %v224_v33 = vpop.f32.mrf.mxu1 }
 0x1ae   :  { %v225_v35 = vadd.f32 %v368_v32, %v224_v33 }
 0x1af   :  { %v430_v34 = vpop.f32.mrf.mxu1 }
 0x1b0   :  { %v231_v39 = vmax.f32 %v225_v35, 0.0 }
 0x1b1   :  { %v227_v36 = vpop.f32.mrf.mxu1 }
 0x1b2   :  { %v228_v37 = vadd.f32 %v368_v32, %v227_v36 }
 0x1b3   :  { %v431_v38 = vpop.f32.mrf.mxu1 }
 0x1b4   :  { %v232_v40 = vmax.f32 %v228_v37, 0.0 }
 0x1b6   :  { %v250_v41 = vpack.c.bf16 %v232_v40, %v231_v39 }
 0x1b8   :  { %449 = vmatmul.mubr.bf16.vlgmr.msra.gmra.mxu0 %v250_v41 }
 0x278   :  { %v339_v43 = vpop.f32.mrf.mxu0 }
 0x279   :  { %v340_v44 = vadd.f32 %v377_v42, %v339_v43 }
 0x27a   :  { %v450_v45 = vpop.f32.mrf.mxu0 }
 0x27b   :  { %346 = vst [vmem:[#allocation7] sm:$0xff] %v340_v44 }
 0x27c   :  { %v342_v46 = vpop.f32.mrf.mxu0 }
 0x27d   :  { %v343_v47 = vadd.f32 %v377_v42, %v342_v46 }
 0x27e   :  { %v451_v48 = vpop.f32.mrf.mxu0 }
 0x27f   :  { %347 = vst [vmem:[#allocation7 + $0x8] sm:$0xff] %v343_v47 }
 0x280   :  { %528 = shalt.err (!%p525_p0)
}
 0x281   :  { %s550_s22 = smov 128   ;;  %s551_s6 = smov 8  }
 0x282   :  { %359 = dma.vmem_to_hbm [thread:$0]  %s354_s21, 256, %s649_s7, [#allocation4], %s550_s22, %s550_s22, %s551_s6  }
 0x283   :  { %541 = dma.done.wait [#allocation4], 256  }
 0x284   :  { %542 = vsyncadd [#allocation4], 4294967040 }
 0x285   :  { %363 = vsyncpa [#allocation3], 1 }
 0x286   :  { %364 = vsyncpa [#allocation6], 1 }
 0x287   :  { %365 = vsyncpa [#allocation4], 1 }

</bundles_post_ra>
